<compile_context>
chip_gen: v7x
topology: tpu7x:2x2x1
jax: 0.10.0
libtpu: 0.0.40
codegen_flags: <defaults>
</compile_context>

<pallas_src>
import functools

import jax
import jax.numpy as jnp
from jax import lax
from jax.experimental import pallas as pl
from jax.experimental.pallas import tpu as pltpu


def _round_up(x, m):
    return (x + m - 1) // m * m


def _choose_tk(hidden, itemsize=2, max_block_bytes=8 << 20):
    """Largest K-tile that divides `hidden`, is lane-aligned (multiple of 128,
    so the per-K slice of the CLS buffer is a clean lane slice) and keeps one
    Wp block <= max_block_bytes (double-buffered pair stays far under v7x's
    64 MiB VMEM)."""
    if hidden % 128 != 0:
        return hidden  # tiny / unaligned hidden: single full block
    for ntiles in range(1, hidden // 128 + 1):
        if hidden % ntiles:
            continue
        tk = hidden // ntiles
        if tk % 128:
            continue
        if tk * hidden * itemsize <= max_block_bytes:
            return tk
    return 128


def _vmem_limit_bytes(hidden, tk, num_prompts_pad, num_labels, classifier_is_vec):
    """Explicit scoped-VMEM budget, capped generation-aware (v7x: 64 MiB phys)."""
    lane_h = _round_up(max(hidden, 128), 128)
    lane_l = _round_up(max(num_labels, 128), 128)
    wc_bytes = (8 * lane_h * 4) if classifier_is_vec else (lane_h * lane_l * 2)
    budget = (
        2 * tk * lane_h * 2                   # double-buffered bf16 Wp K-tile
        + 2 * wc_bytes                        # classifier weight block
        + 4 * 8 * lane_h * 4                  # biases, padded (8,128) f32 tiles
        + 2 * num_prompts_pad * lane_l * 4    # out block
        + num_prompts_pad * lane_h * 4        # gathered CLS rows (f32 staging)
        + num_prompts_pad * lane_h * 4        # f32 pooler accumulator
    )
    budget = int(budget * 1.25) + (2 << 20)   # Mosaic internal scratch slack
    try:
        cap = int(pltpu.get_tpu_info().vmem_capacity_bytes)
    except Exception:
        cap = 64 << 20                        # conservative (v7x-sized) fallback
    return max(4 << 20, min(budget, int(cap * 0.80)))


def _cross_encoding_pooler_kernel(
    offsets_smem,   # SMEM  (Np_pad,) int32       : CLS-token row index per prompt
    hs_hbm,         # HBM   (total_tokens, H) f32 : raw hidden states (pl.ANY)
    wp_ref,         # VMEM  (tk, H)  bf16         : streamed Wp K-tile
    bp_ref,         # VMEM  (1, H)   f32          : pooler dense bias
    wc_ref,         # VMEM  (1, H) f32 | (H, L)   : classifier weight
    bc_ref,         # VMEM  (1, L)   f32          : classifier bias
    out_ref,        # VMEM  (Np_pad, L) f32       : sigmoid(logits), resident
    cls_ref,        # VMEM scratch (Np_pad, H) f32: gathered CLS rows
    acc_ref,        # VMEM scratch (Np_pad, H) f32: pooler matmul accumulator
    gather_sem,     # DMA sems (Np_pad,)
    *,
    tk: int,
    classifier_is_vec: bool,
):
    k = pl.program_id(0)
    num_k = pl.num_programs(0)
    num_prompts_pad = cls_ref.shape[0]

    # --- k == 0: gather every prompt's CLS row with manual DMAs ---------------
    # Only the first (tk, H) Wp block has landed at this point, so these small
    # row DMAs overlap the rest of the Wp stream (the dominant HBM transfer).
    @pl.when(k == 0)
    def _gather_and_init():
        acc_ref[...] = jnp.zeros_like(acc_ref)

        def _issue(p, carry):
            pltpu.make_async_copy(
                hs_hbm.at[pl.ds(offsets_smem[p], 1), :],
                cls_ref.at[pl.ds(p, 1), :],
                gather_sem.at[p],
            ).start()
            return carry

        lax.fori_loop(0, num_prompts_pad, _issue, 0)

        def _wait(p, carry):
            pltpu.make_async_copy(
                hs_hbm.at[pl.ds(offsets_smem[p], 1), :],
                cls_ref.at[pl.ds(p, 1), :],
                gather_sem.at[p],
            ).wait()
            return carry

        lax.fori_loop(0, num_prompts_pad, _wait, 0)

    # --- every k: accumulate this K-tile of the pooler dense matmul -----------
    # (DMA cannot cast, so the f32 staging rows are cast to bf16 per K-slice;
    #  (Np_pad, tk) VPU casts are negligible and hidden under the weight DMA.)
    k_start = pl.multiple_of(k * tk, tk)
    x_k = cls_ref[:, pl.ds(k_start, tk)].astype(wp_ref.dtype)          # (Np, tk) bf16
    acc_ref[...] += jnp.dot(x_k, wp_ref[...], preferred_element_type=jnp.float32)

    # --- last k: tanh + classifier + sigmoid -----------------------------------
    @pl.when(k == num_k - 1)
    def _finalize():
        pooled = jnp.tanh(acc_ref[...] + bp_ref[...])                   # (Np, H) f32
        if classifier_is_vec:
            # num_labels == 1: VPU multiply + lane reduce beats a 1-column MXU matmul.
            logits = jnp.sum(pooled * wc_ref[...], axis=-1, keepdims=True) + bc_ref[...]
        else:
            logits = (
                jnp.dot(pooled.astype(wc_ref.dtype), wc_ref[...],
                        preferred_element_type=jnp.float32)
                + bc_ref[...]
            )
        out_ref[...] = jax.nn.sigmoid(logits).astype(out_ref.dtype)


def cross_encoding_pooler(hidden_states, prompt_lens, wp, bp, wc, bc,
                          *, weight_dtype=jnp.bfloat16, tk=None):
    """hidden_states: (total_tokens, H); prompt_lens: (N,) int32.

    wp, bp: pooler dense (H, H), (1, H)   -> tanh(x @ wp + bp)
    wc, bc: classifier   (H, L), (1, L)   -> x @ wc + bc
    Returns sigmoid(logits) of shape (N, L).
    """
    total_tokens, hidden = hidden_states.shape
    num_prompts = int(prompt_lens.shape[0])
    num_labels = int(wc.shape[-1])
    num_prompts_pad = max(_round_up(num_prompts, 8), 8)

    if tk is None:
        tk = _choose_tk(hidden, itemsize=jnp.dtype(weight_dtype).itemsize)
    assert hidden % tk == 0, f"tk ({tk}) must divide hidden ({hidden})"
    assert tk == hidden or tk % 128 == 0, f"tk ({tk}) must be lane-aligned"
    num_k = hidden // tk

    # Start offset (CLS-token index) of each prompt; padded entries point at row
    # 0 (a valid row) and are dropped by the final slice.
    offsets = jnp.concatenate(
        [jnp.zeros((1,), jnp.int32), jnp.cumsum(prompt_lens.astype(jnp.int32))[:-1]]
    )
    offsets = jnp.pad(offsets, (0, num_prompts_pad - num_prompts))

    # bf16 weights: the kernel is weight-load bound, so halving the Wp HBM
    # transfer ~halves wall clock (and uses the native bf16 MXU on v6e/v7x).
    wp_k = wp.astype(weight_dtype)
    bp_k = jnp.reshape(bp, (1, hidden)).astype(jnp.float32)
    classifier_is_vec = num_labels == 1
    if classifier_is_vec:
        wc_k = jnp.reshape(wc, (1, hidden)).astype(jnp.float32)   # row vector, VPU path
    else:
        wc_k = wc.astype(weight_dtype)                            # (H, L), MXU path
    bc_k = jnp.reshape(bc, (1, num_labels)).astype(jnp.float32)

    kernel = functools.partial(
        _cross_encoding_pooler_kernel, tk=tk, classifier_is_vec=classifier_is_vec
    )

    grid_spec = pltpu.PrefetchScalarGridSpec(
        num_scalar_prefetch=1,
        grid=(num_k,),
        in_specs=[
            # Raw HBM ref; the CLS rows are gathered with manual DMAs at k == 0.
            pl.BlockSpec(memory_space=pl.ANY),
            # Wp streams one (tk, H) K-tile per grid step (double-buffered).
            pl.BlockSpec((tk, hidden), lambda k, off: (k, 0)),
            # Small constant-index blocks: DMA'd once, stay resident.
            pl.BlockSpec((1, hidden), lambda k, off: (0, 0)),           # bp
            pl.BlockSpec(wc_k.shape, lambda k, off: (0, 0)),            # Wc
            pl.BlockSpec((1, num_labels), lambda k, off: (0, 0)),       # bc
        ],
        out_specs=pl.BlockSpec((num_prompts_pad, num_labels), lambda k, off: (0, 0)),
        scratch_shapes=[
            pltpu.VMEM((num_prompts_pad, hidden), jnp.float32),   # gathered CLS rows
            pltpu.VMEM((num_prompts_pad, hidden), jnp.float32),   # pooler accumulator
            pltpu.SemaphoreType.DMA((num_prompts_pad,)),          # one sem per row DMA
        ],
    )

    out = pl.pallas_call(
        kernel,
        out_shape=jax.ShapeDtypeStruct((num_prompts_pad, num_labels), jnp.float32),
        grid_spec=grid_spec,
        compiler_params=pltpu.CompilerParams(
            # Output / accumulator are resident across the K axis -> arbitrary.
            # (Do not megacore this kernel: splitting would duplicate the Wp load.)
            dimension_semantics=("arbitrary",),
            vmem_limit_bytes=_vmem_limit_bytes(
                hidden, tk, num_prompts_pad, num_labels, classifier_is_vec),
        ),
    )(offsets, hidden_states, wp_k, bp_k, wc_k, bc_k)

    return out[:num_prompts]  # (N, num_labels)


def _reference(hidden_states, prompt_lens, wp, bp, wc, bc, weight_dtype=jnp.bfloat16):
    offsets = jnp.concatenate(
        [jnp.zeros((1,), jnp.int32), jnp.cumsum(prompt_lens.astype(jnp.int32))[:-1]]
    )
    cls = hidden_states[offsets]                              # (N, H) first token per prompt
    # Emulate the kernel's bf16 storage of Wp / bf16 cast of the CLS activations.
    cls_c = cls.astype(weight_dtype).astype(jnp.float32)
    wp_c = wp.astype(weight_dtype).astype(jnp.float32)
    pooled = jnp.tanh(cls_c @ wp_c + jnp.reshape(bp, (1, -1)))      # BertPooler
    logits = pooled @ wc + jnp.reshape(bc, (1, -1))                 # classifier (f32, L==1)
    return jax.nn.sigmoid(logits)                                   # default activation


if __name__ == "__main__":
    key = jax.random.PRNGKey(0)
    k1, k2, k3, k4, k5 = jax.random.split(key, 5)

    HIDDEN = 256          # lane-aligned hidden size
    NUM_LABELS = 1        # sigmoid activation path
    prompt_lens = jnp.array([5, 3], dtype=jnp.int32)   # 2 prompts, 8 tokens total
    total_tokens = int(prompt_lens.sum())

    hidden_states = jax.random.normal(k1, (total_tokens, HIDDEN), jnp.float32)
    wp = jax.random.normal(k2, (HIDDEN, HIDDEN), jnp.float32) * 0.05
    bp = jax.random.normal(k3, (1, HIDDEN), jnp.float32) * 0.05
    wc = jax.random.normal(k4, (HIDDEN, NUM_LABELS), jnp.float32) * 0.05
    bc = jax.random.normal(k5, (1, NUM_LABELS), jnp.float32) * 0.05

    # tk=128 forces two K-tiles so the streamed-accumulation path is exercised.
    out = cross_encoding_pooler(hidden_states, prompt_lens, wp, bp, wc, bc, tk=128)
    out = jax.block_until_ready(out)

    ref = _reference(hidden_states, prompt_lens, wp, bp, wc, bc)
    assert out.shape == (2, NUM_LABELS), out.shape
    assert jnp.allclose(out, ref, atol=2e-3, rtol=2e-3), (out, ref)

    print("KERNEL_OK")
</pallas_src>

<mosaic_0001>
module attributes {stable_mosaic.version = 11 : i64} {
  func.func @_cross_encoding_pooler_kernel(%arg0: i32, %arg1: memref<8xi32, #tpu.memory_space<smem>>, %arg2: memref<8x256xf32, #tpu.memory_space<any>>, %arg3: memref<128x256xbf16, #tpu.memory_space<vmem>>, %arg4: memref<1x256xf32, #tpu.memory_space<vmem>>, %arg5: memref<1x256xf32, #tpu.memory_space<vmem>>, %arg6: memref<1x1xf32, #tpu.memory_space<vmem>>, %arg7: memref<8x1xf32, #tpu.memory_space<vmem>>, %arg8: memref<8x256xf32, #tpu.memory_space<vmem>>, %arg9: memref<8x256xf32, #tpu.memory_space<vmem>>, %arg10: memref<8x!tpu.dma_semaphore, #tpu.memory_space<semaphore_mem>>) attributes {dimension_semantics = [#tpu.dimension_semantics<arbitrary>], iteration_bounds = array<i64: 2>, scalar_prefetch = 1 : i64, scratch_operands = 3 : i64, tpu.core_type = #tpu.core_type<tc>, window_params = [{}, {transform_indices = @transform_1, window_bounds = array<i64: 128, 256>}, {pipeline_mode = #tpu.pipeline_mode<synchronous>, transform_indices = @transform_2, window_bounds = array<i64: 1, 256>}, {pipeline_mode = #tpu.pipeline_mode<synchronous>, transform_indices = @transform_3, window_bounds = array<i64: 1, 256>}, {pipeline_mode = #tpu.pipeline_mode<synchronous>, transform_indices = @transform_4, window_bounds = array<i64: 1, 1>}, {pipeline_mode = #tpu.pipeline_mode<synchronous>, transform_indices = @transform_5, window_bounds = array<i64: 8, 1>}]} {
    %c0_i32 = arith.constant 0 : i32
    %0 = arith.cmpi eq, %arg0, %c0_i32 : i32
    %1 = arith.extui %0 : i1 to i32
    %c0_i32_0 = arith.constant 0 : i32
    %2 = arith.cmpi ne, %1, %c0_i32_0 : i32
    scf.if %2 {
      %cst_8 = arith.constant 0.000000e+00 : f32
      %16 = vector.broadcast %cst_8 : f32 to vector<8x256xf32>
      %c0_9 = arith.constant 0 : index
      %c0_10 = arith.constant 0 : index
      %17 = vector.load %arg9[%c0_9, %c0_10] : memref<8x256xf32, #tpu.memory_space<vmem>>, vector<8x256xf32>
      tpu.vector_store %arg9[%c0_9, %c0_10], %16 {strides = array<i32>} : memref<8x256xf32, #tpu.memory_space<vmem>>, vector<8x256xf32>,
      %c0_i32_11 = arith.constant 0 : i32
      %c8_i32 = arith.constant 8 : i32
      %18 = arith.addi %c0_i32_11, %c8_i32 : i32
      %c1_i32_12 = arith.constant 1 : i32
      scf.for %arg11 = %c0_i32_11 to %18 step %c1_i32_12  : i32 {
        %20 = arith.index_cast %arg11 : i32 to index
        %21 = memref.load %arg1[%20] : memref<8xi32, #tpu.memory_space<smem>>
        %c0_i32_18 = arith.constant 0 : i32
        %22 = tpu.memref_slice %arg2[%21, %c0_i32_18] : memref<8x256xf32, #tpu.memory_space<any>> -> memref<1x256xf32, #tpu.memory_space<any>>
        %c0_i32_19 = arith.constant 0 : i32
        %23 = tpu.memref_slice %arg8[%arg11, %c0_i32_19] : memref<8x256xf32, #tpu.memory_space<vmem>> -> memref<1x256xf32, #tpu.memory_space<vmem>>
        %24 = tpu.memref_slice %arg10[%arg11] : memref<8x!tpu.dma_semaphore, #tpu.memory_space<semaphore_mem>> -> memref<1x!tpu.dma_semaphore, #tpu.memory_space<semaphore_mem>>
        %25 = tpu.memref_squeeze %24 : memref<1x!tpu.dma_semaphore, #tpu.memory_space<semaphore_mem>> -> memref<!tpu.dma_semaphore, #tpu.memory_space<semaphore_mem>>
        tpu.enqueue_dma source(%22 : memref<1x256xf32, #tpu.memory_space<any>>) target(%23 : memref<1x256xf32, #tpu.memory_space<vmem>>) target_semaphore(%25 : memref<!tpu.dma_semaphore, #tpu.memory_space<semaphore_mem>>)
      }
      %c8_i32_13 = arith.constant 8 : i32
      %c0_i32_14 = arith.constant 0 : i32
      %c8_i32_15 = arith.constant 8 : i32
      %19 = arith.addi %c0_i32_14, %c8_i32_15 : i32
      %c1_i32_16 = arith.constant 1 : i32
      scf.for %arg11 = %c0_i32_14 to %19 step %c1_i32_16  : i32 {
        %20 = arith.index_cast %arg11 : i32 to index
        %21 = memref.load %arg1[%20] : memref<8xi32, #tpu.memory_space<smem>>
        %c0_i32_18 = arith.constant 0 : i32
        %22 = tpu.memref_slice %arg2[%21, %c0_i32_18] : memref<8x256xf32, #tpu.memory_space<any>> -> memref<1x256xf32, #tpu.memory_space<any>>
        %c0_i32_19 = arith.constant 0 : i32
        %23 = tpu.memref_slice %arg8[%arg11, %c0_i32_19] : memref<8x256xf32, #tpu.memory_space<vmem>> -> memref<1x256xf32, #tpu.memory_space<vmem>>
        %24 = tpu.memref_slice %arg10[%arg11] : memref<8x!tpu.dma_semaphore, #tpu.memory_space<semaphore_mem>> -> memref<1x!tpu.dma_semaphore, #tpu.memory_space<semaphore_mem>>
        %25 = tpu.memref_squeeze %24 : memref<1x!tpu.dma_semaphore, #tpu.memory_space<semaphore_mem>> -> memref<!tpu.dma_semaphore, #tpu.memory_space<semaphore_mem>>
        tpu.wait_dma2 semaphore(%25 : memref<!tpu.dma_semaphore, #tpu.memory_space<semaphore_mem>>) src(%22 : memref<1x256xf32, #tpu.memory_space<any>>) dst(%23 : memref<1x256xf32, #tpu.memory_space<vmem>>)
      }
      %c8_i32_17 = arith.constant 8 : i32
    } else {
    }
    %c128_i32 = arith.constant 128 : i32
    %3 = arith.muli %arg0, %c128_i32 : i32
    %4 = tpu.assume_multiple %3, 128 : i32
    %c0 = arith.constant 0 : index
    %5 = arith.index_cast %4 : i32 to index
    %6 = vector.load %arg8[%c0, %5] : memref<8x256xf32, #tpu.memory_space<vmem>>, vector<8x128xf32>
    %7 = arith.truncf %6 : vector<8x128xf32> to vector<8x128xbf16>
    %c0_1 = arith.constant 0 : index
    %c0_2 = arith.constant 0 : index
    %8 = vector.load %arg9[%c0_1, %c0_2] : memref<8x256xf32, #tpu.memory_space<vmem>>, vector<8x256xf32>
    %c0_3 = arith.constant 0 : index
    %c0_4 = arith.constant 0 : index
    %9 = vector.load %arg3[%c0_3, %c0_4] : memref<128x256xbf16, #tpu.memory_space<vmem>>, vector<128x256xbf16>
    %cst = arith.constant dense<0.000000e+00> : vector<8x256xf32>
    %10 = tpu.matmul %7, %9, %cst {dimension_numbers = #tpu.dot_dimension_numbers<[1], [0], [0], [1], [0, 0, 1, 1], [], []>} : vector<8x128xbf16>, vector<128x256xbf16>, vector<8x256xf32> -> vector<8x256xf32>
    %11 = arith.addf %8, %10 : vector<8x256xf32>
    %c0_5 = arith.constant 0 : index
    %c0_6 = arith.constant 0 : index
    %12 = vector.load %arg9[%c0_5, %c0_6] : memref<8x256xf32, #tpu.memory_space<vmem>>, vector<8x256xf32>
    tpu.vector_store %arg9[%c0_5, %c0_6], %11 {strides = array<i32>} : memref<8x256xf32, #tpu.memory_space<vmem>>, vector<8x256xf32>,
    %c1_i32 = arith.constant 1 : i32
    %13 = arith.cmpi eq, %arg0, %c1_i32 : i32
    %14 = arith.extui %13 : i1 to i32
    %c0_i32_7 = arith.constant 0 : i32
    %15 = arith.cmpi ne, %14, %c0_i32_7 : i32
    scf.if %15 {
      %c0_8 = arith.constant 0 : index
      %c0_9 = arith.constant 0 : index
      %16 = vector.load %arg9[%c0_8, %c0_9] : memref<8x256xf32, #tpu.memory_space<vmem>>, vector<8x256xf32>
      %c0_10 = arith.constant 0 : index
      %c0_11 = arith.constant 0 : index
      %17 = vector.load %arg4[%c0_10, %c0_11] : memref<1x256xf32, #tpu.memory_space<vmem>>, vector<1x256xf32>
      %18 = vector.broadcast %17 : vector<1x256xf32> to vector<8x256xf32>
      %19 = arith.addf %16, %18 : vector<8x256xf32>
      %20 = math.tanh %19 : vector<8x256xf32>
      %c0_12 = arith.constant 0 : index
      %c0_13 = arith.constant 0 : index
      %21 = vector.load %arg5[%c0_12, %c0_13] : memref<1x256xf32, #tpu.memory_space<vmem>>, vector<1x256xf32>
      %22 = vector.broadcast %21 : vector<1x256xf32> to vector<8x256xf32>
      %23 = arith.mulf %20, %22 : vector<8x256xf32>
      %cst_14 = arith.constant dense<0.000000e+00> : vector<8xf32>
      %24 = vector.multi_reduction <add>, %23, %cst_14 [1] : vector<8x256xf32> to vector<8xf32>
      %25 = vector.shape_cast %24 : vector<8xf32> to vector<8x1xf32>
      %c0_15 = arith.constant 0 : index
      %c0_16 = arith.constant 0 : index
      %26 = vector.load %arg6[%c0_15, %c0_16] : memref<1x1xf32, #tpu.memory_space<vmem>>, vector<1x1xf32>
      %27 = vector.broadcast %26 : vector<1x1xf32> to vector<8x1xf32>
      %28 = arith.addf %25, %27 : vector<8x1xf32>
      %29 = arith.negf %28 : vector<8x1xf32>
      %30 = math.exp %29 : vector<8x1xf32>
      %cst_17 = arith.constant 1.000000e+00 : f32
      %31 = vector.broadcast %cst_17 : f32 to vector<8x1xf32>
      %32 = arith.addf %31, %30 : vector<8x1xf32>
      %33 = arith.divf %31, %32 : vector<8x1xf32>
      %c0_18 = arith.constant 0 : index
      %c0_19 = arith.constant 0 : index
      %34 = vector.load %arg7[%c0_18, %c0_19] : memref<8x1xf32, #tpu.memory_space<vmem>>, vector<8x1xf32>
      tpu.vector_store %arg7[%c0_18, %c0_19], %33 {strides = array<i32>} : memref<8x1xf32, #tpu.memory_space<vmem>>, vector<8x1xf32>,
    } else {
    }
    return
  }
  func.func @transform_1(%arg0: i32, %arg1: memref<8xi32, #tpu.memory_space<smem>>) -> (i32, i32) {
    %c0_i32 = arith.constant 0 : i32
    %c0_i32_0 = arith.constant 0 : i32
    return %arg0, %c0_i32 : i32, i32
  }
  func.func @transform_2(%arg0: i32, %arg1: memref<8xi32, #tpu.memory_space<smem>>) -> (i32, i32) {
    %c0_i32 = arith.constant 0 : i32
    %c0_i32_0 = arith.constant 0 : i32
    %c0_i32_1 = arith.constant 0 : i32
    return %c0_i32, %c0_i32_0 : i32, i32
  }
  func.func @transform_3(%arg0: i32, %arg1: memref<8xi32, #tpu.memory_space<smem>>) -> (i32, i32) {
    %c0_i32 = arith.constant 0 : i32
    %c0_i32_0 = arith.constant 0 : i32
    %c0_i32_1 = arith.constant 0 : i32
    return %c0_i32, %c0_i32_0 : i32, i32
  }
  func.func @transform_4(%arg0: i32, %arg1: memref<8xi32, #tpu.memory_space<smem>>) -> (i32, i32) {
    %c0_i32 = arith.constant 0 : i32
    %c0_i32_0 = arith.constant 0 : i32
    %c0_i32_1 = arith.constant 0 : i32
    return %c0_i32, %c0_i32_0 : i32, i32
  }
  func.func @transform_5(%arg0: i32, %arg1: memref<8xi32, #tpu.memory_space<smem>>) -> (i32, i32) {
    %c0_i32 = arith.constant 0 : i32
    %c0_i32_0 = arith.constant 0 : i32
    %c0_i32_1 = arith.constant 0 : i32
    return %c0_i32, %c0_i32_0 : i32, i32
  }
}

</mosaic_0001>

<bundles_post_ra>
// kernel: tpu_custom_call.1
= control target key start
LH: loop header
LB: loop body
LE: loop exit
PB: predicated region body
PF: predicated region fallthrough
CT: control target
= control target key end

     0   :  { %s1056_s0 = inlined_call_operand.vmem [shape: s32[8], index: 0, kind: input, shape index: {}]   ;;  %s1057_s1 = inlined_call_operand.hbm [shape: f32[8,256], index: 1, kind: input, shape index: {}]   ;;  %s1058_s2 = inlined_call_operand.hbm [shape: bf16[256,256], index: 2, kind: input, shape index: {}]   ;;  %s1059_s3 = inlined_call_operand.vmem [shape: f32[1,256], index: 3, kind: input, shape index: {}]   ;;  %s1060_s4 = inlined_call_operand.vmem [shape: f32[1,256], index: 4, kind: input, shape index: {}]   ;;  %s1061_s6 = inlined_call_operand.vmem [shape: f32[8,1], index: 6, kind: output, shape index: {}]   ;;  %s1062_s5 = inlined_call_operand.<no memory space> [shape: f32[1,1], index: 5, kind: input, shape index: {}]  }
   0x1   :  { %s11_s23 = sshll.u32 %s1056_s0, 4  ;;  %v15_v0 = vstv %s1062_s5  ;;  %s12_s23 = int_to_ptr.vmem [resolvable:$true] %s11_s23 }
   0x2   :  { %16 = vst [vmem:[#allocation7] sm:$0x1] %v15_v0  ;;  %s717_s26 = scalar_lea.vmem %s12_s23, 16  ;;  %p722_p1 = scmp.lt.s32.totalorder %s12_s23, %s12_s23 }
   0x3   :  { %p718_p0 = scmp.ne.s32.totalorder %s12_s23, %s717_s26  ;;  %p723_p2 = scmp.lt.s32.totalorder %s717_s26, %s717_s26 }
   0x5   :  { %p724_p3 = por %p723_p2, %p722_p1 }
   0x7   :  { %p725_p4 = pnand %p724_p3, %p718_p0 }
   0x9   :  { %728 = shalt.err (!%p725_p4)  }
   0xa   :  { %s839_s27 = smov [#allocation6]  }
   0xb   :  { %14 = dma.vmem_to_smem %s12_s23, 16, %s839_s27, [#allocation5] }
   0xc   :  { %807 = dma.done.wait [#allocation5], 16 }
   0xd   :  { %808 = vsyncadd [#allocation5], 4294967280 }
   0xe   :  { %18 = sfence }
   0xf   :  { %19 = vsyncpa [#allocation9], 0 }
  0x10   :  { %21 = vsyncpa [#allocation9 + $0x1], 0  ;;  %s889_s0 = smov 0   ;;  %s891_s28 = smov 0  }
  0x11   :  { %s893_s5 = smov 0   ;;  %s895_s29 = smov 0  }
  0x12 LB: > { %s908_s30 = sadd.s32 4294967295, %s829_s29   ;;  %s911_s7 = sadd.s32 1, %s829_s29   ;;  %s829_s29 = sphi %s895_s29, %s1069_s29   ;;  %s825_s5 = sphi %s893_s5, %s1068_s5   ;;  %s821_s28 = sphi %s891_s28, %s1067_s28   ;;  %s817_s0 = sphi %s889_s0, %s1066_s0  }
  0x13   : > { %s31_s8 = ssub.s32 %s829_s29, %s911_s7  ;;  %s34_s9 = sadd.s32 1, %s825_s5 }
  0x14   : > { %p32_p5 = scmp.eq.s32.totalorder %s31_s8, 0  ;;  %p41_p6 = scmp.ne.s32.totalorder %s825_s5, %s821_s28 }
  0x15   : > { %p42_p7 = scmp.eq.s32.totalorder %s829_s29, 0  ;;  %p47_p8 = scmp.ne.s32.totalorder %s821_s28, %s817_s0 }
  0x16   : > { %s921_s10 = scalar_select %p32_p5, %s825_s5, %s34_s9  }
  0x17   : > { %p43_p9 = por %p42_p7, %p41_p6  ;;  %p48_p10 = scmp.eq.s32.totalorder %s908_s30, 0 }
  0x18   : > { %p629_p11 = scmp.lt.s32.totalorder %s829_s29, 2  ;;  %s164_s12 = sand.u32 1, %s825_s5  }
  0x19   : > { %p925_p12 = por %p48_p10, %p47_p8  ;;  %s580_s13 = sshll.u32 %s164_s12, 7 }
  0x1a   : > { %s622_s14 = sshll.u32 %s829_s29, 11  ;;  %s168_s18 = scalar_lea.vmem [#allocation8], %s580_s13 }
  0x1b   : > { %s934_s17 = scalar_lea.hbm %s1058_s2, %s622_s14  ;;  %s176_s19 = sshll.u32 %s168_s18, 4  ;;  %s936_s19 = int_to_ptr.vmem [resolvable:$true] %s176_s19 }
  0x1c   : > { %p938_p13 = pnand %p629_p11, %p43_p9  ;;  %s943_s21 = scalar_lea.sflag [#allocation9], %s164_s12 }
  0x1d   : > { %s729_s22 = scalar_lea.hbm %s934_s17, 2048  ;;  %s734_s25 = scalar_lea.hbm %s1058_s2, 4096 }
  0x1e   : > { %p730_p1 = scmp.ne.s32.totalorder %s934_s17, %s729_s22  ;;  %p731_p2 = pneg %p938_p13 }
  0x1f   : > { %p735_p5 = scmp.lt.u32.totalorder %s934_s17, %s1058_s2  ;;  %p736_p6 = scmp.lt.u32.totalorder %s734_s25, %s729_s22 }
  0x20   : > { %p732_p3 = pnand %p731_p2, %p730_p1  ;;  %p738_p8 = scmp.lt.u32.totalorder %s729_s22, %s934_s17 }
  0x21   : > { %p737_p7 = por %p736_p6, %p735_p5 }
  0x22   : > { %p733_p4 = pneg %p732_p3 }
  0x23   : > { %p739_p9 = por %p738_p8, %p737_p7 }
  0x25   : > { %p740_p10 = pnand %p739_p9, %p733_p4 }
  0x27   : > { %743 = shalt.err (!%p740_p10)
}
  0x28   : > { %s744_s0 = scalar_lea.vmem %s936_s19, 2048  ;;  %s840_s8 = smov [#allocation8]  }
  0x29   : > { %p745_p11 = scmp.ne.s32.totalorder %s936_s19, %s744_s0  ;;  %s749_s9 = sshll.u32 %s840_s8, 4  ;;  %s750_s9 = int_to_ptr.vmem [resolvable:$false] %s749_s9 }
  0x2a   : > { %s751_s12 = scalar_lea.vmem %s750_s9, 4096  ;;  %p752_p0 = scmp.lt.s32.totalorder %s936_s19, %s750_s9 }
  0x2b   : > { %p747_p1 = pnand %p745_p11, %p731_p2  ;;  %p753_p5 = scmp.lt.s32.totalorder %s751_s12, %s744_s0 }
  0x2d   : > { %p748_p3 = pneg %p747_p1  ;;  %p754_p6 = por %p753_p5, %p752_p0 }
  0x2f   : > { %p755_p7 = pnand %p754_p6, %p748_p3 }
  0x31   : > { %758 = shalt.err (!%p755_p7)
}
  0x32   : > { %s841_s13 = smov 128   ;;  %s842_s14 = smov 8  }
  0x33   : > { %628 = dma.hbm_to_vmem [thread:$0]  (!%p938_p13), %s934_s17, 2048, %s936_s19, %s943_s21, %s841_s13, %s841_s13, %s842_s14  }
  0x34   : > { %p184_p2 = scmp.lt.s32.totalorder %s829_s29, 3  ;;  %p1065_p4 = scmp.ge.s32.totalorder %s829_s29, 1 }
  0x36   : > { %p185_p8 = pnand %p1065_p4, %p184_p2 }
  0x37   : > { %s190_s15 = sand.u32 (!%p185_p8), 1, %s821_s28  }
  0x38   : > { %188 = sbr.rel (%p185_p8) target bundleno = 572 (0x23c), region = 36  ;;  %s585_s16 = sshll.u32 (!%p185_p8), %s190_s15, 7 }
  0x39   : > { %s191_s18 = scalar_lea.sflag (!%p185_p8), [#allocation9], %s190_s15  ;;  %s975_s22 = scalar_lea.vmem (!%p185_p8), [#allocation8], %s585_s16 }
  0x3f   : > { %810 = dma.done.wait (%p925_p12), %s191_s18, 2048  }
  0x40   : > { %812 = vsyncadd (%p925_p12), %s191_s18, 4294965248  ;;  %p586_p0 = scmp.ne.s32.totalorder %s908_s30, 0 }
  0x41   : > { %v843_v1 = vmov (!%p586_p0), 0.0   ;;  %s982_s29 = smov (!%p586_p0), 0  }
  0x42   : > { %219 = sbr.rel (%p586_p0) target bundleno = 128 (0x80), region = 44  ;;  %220 = vst [vmem:[#allocation3] sm:$0xff] (!%p586_p0), %v843_v1  ;;  %221 = vst [vmem:[#allocation3 + $0x8] sm:$0xff] (!%p586_p0), %v843_v1 }
  0x49 LB: >> { %s228_s17 = sld [smem:[#allocation6 + %s833_s29]]  ;;  %s235_s11 = sshrl.u32 %s833_s29, 3  ;;  %s833_s29 = sphi %s982_s29, %s227_s29  }
  0x4a   : >> { %s236_s19 = sand.u32 7, %s833_s29   ;;  %s589_s20 = sshll.u32 %s235_s11, 4 }
  0x4b   : >> { %s238_s21 = sadd.s32 %s589_s20, %s236_s19  ;;  %s240_s14 = scalar_lea.sflag [#allocation4], %s833_s29 }
  0x4c   : >> { %s239_s23 = scalar_lea.vmem [#allocation2], %s238_s21 }
  0x4d   : >> { %s242_s24 = sshll.u32 %s239_s23, 4  ;;  %s990_s24 = int_to_ptr.vmem [resolvable:$true] %s242_s24 }
  0x4f   : >> { %s229_s25 = sshrl.u32 %s228_s17, 3  ;;  %s230_s26 = sand.u32 7, %s228_s17  }
  0x50   : >> { %s587_s27 = sshll.u32 %s229_s25, 4  ;;  %s761_s17 = scalar_lea.hbm %s1057_s1, 256 }
  0x51   : >> { %s232_s0 = sadd.s32 %s587_s27, %s230_s26 }
  0x52   : >> { %s588_s8 = sshll.u32 %s232_s0, 4 }
  0x53   : >> { %s995_s13 = scalar_lea.hbm %s1057_s1, %s588_s8 }
  0x54   : >> { %s759_s15 = scalar_lea.hbm %s995_s13, 32  ;;  %p762_p13 = scmp.lt.u32.totalorder %s995_s13, %s1057_s1 }
  0x55   : >> { %p760_p12 = scmp.ne.s32.totalorder %s995_s13, %s759_s15  ;;  %p763_p9 = scmp.lt.u32.totalorder %s761_s17, %s759_s15 }
  0x56   : >> { %p765_p11 = scmp.lt.u32.totalorder %s759_s15, %s995_s13 }
  0x57   : >> { %p764_p10 = por %p763_p9, %p762_p13 }
  0x59   : >> { %p766_p1 = por %p765_p11, %p764_p10 }
  0x5b   : >> { %p767_p3 = pnand %p766_p1, %p760_p12 }
  0x5d   : >> { %770 = shalt.err (!%p767_p3)  }
  0x5e   : >> { %s771_s20 = scalar_lea.vmem %s990_s24, 32  ;;  %s844_s21 = smov [#allocation2]  }
  0x5f   : >> { %p772_p5 = scmp.ne.s32.totalorder %s990_s24, %s771_s20  ;;  %s773_s23 = sshll.u32 %s844_s21, 4  ;;  %s774_s23 = int_to_ptr.vmem [resolvable:$false] %s773_s23 }
  0x60   : >> { %s775_s25 = scalar_lea.vmem %s774_s23, 256  ;;  %p776_p6 = scmp.lt.s32.totalorder %s990_s24, %s774_s23 }
  0x61   : >> { %p777_p7 = scmp.lt.s32.totalorder %s775_s25, %s771_s20 }
  0x63   : >> { %p778_p2 = por %p777_p7, %p776_p6 }
  0x65   : >> { %p779_p4 = pnand %p778_p2, %p772_p5 }
  0x67   : >> { %782 = shalt.err (!%p779_p4)  }
  0x68   : >> { %s845_s26 = smov 128   ;;  %s846_s27 = smov 1  }
  0x69   : >> { %245 = dma.hbm_to_vmem [thread:$0]  %s995_s13, 32, %s990_s24, %s240_s14, %s845_s26, %s845_s26, %s846_s27 }
  0x6a   : >> { %s227_s29 = sadd.s32 1, %s833_s29  }
  0x6b   : >> { %p224_p8 = scmp.ge.s32.totalorder %s227_s29, 8  }
  0x6c   : > { %s835_s0 = smov (%p224_p8), 0  }
  0x6d   : > { %226 = sbr.rel (!%p224_p8) target bundleno = 73 (0x49), region = 106 }
  0x74 LB: >> { %s253_s8 = scalar_lea.sflag [#allocation4], %s837_s0  ;;  %s837_s0 = sphi %s835_s0, %s251_s0  }
  0x75   : >> { %813 = dma.done.wait %s253_s8, 32 }
  0x76   : >> { %814 = vsyncadd %s253_s8, 4294967264  ;;  %s251_s0 = sadd.s32 1, %s837_s0  }
  0x77   : >> { %p248_p0 = scmp.ge.s32.totalorder %s251_s0, 8  }
  0x79   : > { %250 = sbr.rel (!%p248_p0) target bundleno = 116 (0x74), region = 117 }
  0x80 PF: > { %v685_v2 = vld [vmem:[%s975_s22 + $0x4] ss:$8 sps:$4 sm:$0xff]   ;;  %v687_v3 = vld [vmem:[%s975_s22] ss:$8 sps:$4 sm:$0xff]   ;;  %v847_v4 = vmov 0   ;;  %s590_s29 = sshll.u32 %s908_s30, 7 }
  0x81   : > { %394 = vmatprep.mubr.bf16.mxu0 %v847_v4  ;;  %362 = vmatprep.subr.bf16.mxu0 %v685_v2  ;;  %v688_v5 = vld [vmem:[%s975_s22 + $0x14] ss:$8 sps:$4 sm:$0xff]   ;;  %v690_v6 = vld [vmem:[%s975_s22 + $0x10] ss:$8 sps:$4 sm:$0xff]   ;;  %v691_v7 = vld [vmem:[%s975_s22 + $0x24] ss:$8 sps:$4 sm:$0xff]  }
  0x82   : > { %363 = vmatpush1.bf16.msra.mxu0 %v687_v3  ;;  %v693_v8 = vld [vmem:[%s975_s22 + $0x20] ss:$8 sps:$4 sm:$0xff]   ;;  %v694_v9 = vld [vmem:[%s975_s22 + $0x34] ss:$8 sps:$4 sm:$0xff]   ;;  %v696_v10 = vld [vmem:[%s975_s22 + $0x30] ss:$8 sps:$4 sm:$0xff]  }
  0x83   : > { %364 = vmatprep.subr.bf16.mxu0 %v688_v5  ;;  %v697_v11 = vld [vmem:[%s975_s22 + $0x44] ss:$8 sps:$4 sm:$0xff]   ;;  %v699_v12 = vld [vmem:[%s975_s22 + $0x40] ss:$8 sps:$4 sm:$0xff]   ;;  %v700_v13 = vld [vmem:[%s975_s22 + $0x54] ss:$8 sps:$4 sm:$0xff]  }
  0x84   : > { %s258_s24 = sshra.s32 %s590_s29, 7  ;;  %v702_v14 = vld [vmem:[%s975_s22 + $0x50] ss:$8 sps:$4 sm:$0xff]   ;;  %v703_v15 = vld [vmem:[%s975_s22 + $0x64] ss:$8 sps:$4 sm:$0xff]   ;;  %p608_p12 = scmp.ne.s32.totalorder %s908_s30, 1 }
  0x85   : > { %s591_s9 = sshll.u32 %s258_s24, 3  ;;  %v705_v16 = vld [vmem:[%s975_s22 + $0x60] ss:$8 sps:$4 sm:$0xff]   ;;  %v706_v17 = vld [vmem:[%s975_s22 + $0x74] ss:$8 sps:$4 sm:$0xff]   ;;  %v415_v29 = vlaneseq (!%p608_p12)  ;;  %vm460_vm0 = vcmask (!%p608_p12), 7168  }
  0x86   : > { %365 = vmatpush1.bf16.msra.mxu0 %v690_v6  ;;  %v708_v18 = vld [vmem:[%s975_s22 + $0x70] ss:$8 sps:$4 sm:$0xff]   ;;  %s261_s12 = scalar_lea.vmem [#allocation2], %s591_s9  ;;  %v413_v31 = vld [vmem:[%s1059_s3] sm:$0x3] (!%p608_p12) }
  0x87   : > { %366 = vmatprep.subr.bf16.mxu0 %v691_v7  ;;  %v262_v19 = vld [vmem:[%s261_s12] sm:$0xff]  ;;  %v264_v21 = vld [vmem:[#allocation3] sm:$0xff]  ;;  %v265_v22 = vld [vmem:[#allocation3 + $0x8] sm:$0xff]  ;;  %v416_v30 = vshrl.u32 (!%p608_p12), %v415_v29, 7 }
  0x88   : > { %v263_v20 = vpack.c.bf16 %v262_v19, %v262_v19  ;;  %v429_v40 = vld [vmem:[%s1060_s4] sm:$0x3] (!%p608_p12) }
  0x89   : > { %v417_v32 = vsub.s32 (!%p608_p12), 0, %v416_v30  ;;  %v421_v33 = vsub.s32 (!%p608_p12), 1, %v416_v30  ;;  %v609_v48 = vld [vmem:[#allocation7] ss:$0 sm:$0xff] (!%p608_p12) }
  0x8a   : > { %367 = vmatpush1.bf16.msra.mxu0 %v693_v8 }
  0x8b   : > { %368 = vmatprep.subr.bf16.mxu0 %v694_v9  ;;  %v418_v36 = vrot.slane (!%p608_p12), %v413_v31, %v417_v32  ;;  %v422_v37 = vrot.slane (!%p608_p12), %v413_v31, %v421_v33  ;;  %v434_v41 = vrot.slane (!%p608_p12), %v429_v40, %v417_v32  ;;  %v438_v42 = vrot.slane (!%p608_p12), %v429_v40, %v421_v33 }
  0x8e   : > { %369 = vmatpush1.bf16.msra.mxu0 %v696_v10 }
  0x8f   : > { %370 = vmatprep.subr.bf16.mxu0 %v697_v11 }
  0x92   : > { %371 = vmatpush1.bf16.msra.mxu0 %v699_v12 }
  0x93   : > { %372 = vmatprep.subr.bf16.mxu0 %v700_v13 }
  0x96   : > { %373 = vmatpush1.bf16.msra.mxu0 %v702_v14 }
  0x97   : > { %374 = vmatprep.subr.bf16.mxu0 %v703_v15 }
  0x9a   : > { %375 = vmatpush1.bf16.msra.mxu0 %v705_v16 }
  0x9b   : > { %376 = vmatprep.subr.bf16.mxu0 %v706_v17 }
  0x9e   : > { %377 = vmatpush1.bf16.msra.mxu0 %v708_v18 }
  0xa1   : > { %395 = vmatmul.mubr.bf16.vlgmr.msra.gmra.mrb[0].mxu0 %v263_v20 }
 0x172   : > { %410 = sbr.rel (%p608_p12) target bundleno = 572 (0x23c), region = 62 }
 0x174   : > { %v396_v23 = vpop.f32.mrb[0].mxu0 }
 0x175   : > { %v403_v24 = vadd.f32 %v396_v23, %v264_v21  ;;  %v398_v25 = vpop.f32.mrb[1].mxu0 }
 0x176   : > { %v404_v26 = vadd.f32 %v398_v25, %v265_v22  ;;  %v400_v27 = vpop.f32.mrb[2].mxu0 }
 0x177   : > { %405 = vst [vmem:[#allocation3] sm:$0xff] %v403_v24  ;;  %v401_v28 = vpop.f32.mrb[3].mxu0 }
 0x178   : > { %406 = vst [vmem:[#allocation3 + $0x8] sm:$0xff] %v404_v26 }
 0x17e   : > { %v411_v34 = vld [vmem:[#allocation3] sm:$0xff] }
 0x17f   : > { %v412_v35 = vld [vmem:[#allocation3 + $0x8] sm:$0xff]  ;;  %v425_v38 = vadd.f32 %v418_v36, %v411_v34 }
 0x180   : > { %v426_v39 = vadd.f32 %v422_v37, %v412_v35 }
 0x181   : > { %709 = vtanh.f32 %v425_v38 }
 0x182   : > { %711 = vtanh.f32 %v426_v39 }
 0x18b   : > { %v710_v43 = vpop.eup %709 }
 0x18c   : > { %v712_v44 = vpop.eup %711  ;;  %v441_v45 = vmul.f32 %v710_v43, %v434_v41 }
 0x18d   : > { %v442_v46 = vmul.f32 %v712_v44, %v438_v42 }
 0x18f   : > { %v443_v47 = vadd.f32 %v442_v46, %v441_v45 }
 0x191   : > { %444 = vadd.xlane.f32.xlu0 %v443_v47 }
 0x21e   : > { %v445_v49 = vpop.xlane.xlu0 %444 }
 0x21f   : > { %v453_v50 = vadd.f32 %v609_v48, %v445_v49 }
 0x221   : > { %v610_v51 = vmul.f32 -1.442695, %v453_v50 }
 0x223   : > { %713 = vpow2.f32 %v610_v51 }
 0x22d   : > { %v714_v52 = vpop.eup %713 }
 0x22e   : > { %v457_v53 = vadd.f32 1.0, %v714_v52 }
 0x230   : > { %715 = vrcp.f32 %v457_v53 }
 0x23a   : > { %v716_v54 = vpop.eup %715 }
 0x23b   : > { %461 = vst.msk [vmem:[%s1061_s6] sm:$0xff] %vm460_vm0, %v716_v54 }
 0x23c PF: > { %p24_p13 = scmp.ge.s32.totalorder %s911_s7, 4   ;;  %s1066_s0 = smov %s821_s28 }
 0x23d   : > { %s1067_s28 = smov %s825_s5  ;;  %s1068_s5 = smov %s921_s10 }
 0x23e   : > { %s1069_s29 = smov %s911_s7  ;;  %26 = sbr.rel (!%p24_p13) target bundleno = 18 (0x12), region = 128 }
 0x245   :  { %473 = vsyncpa [#allocation9], 1 }
 0x246   :  { %475 = vsyncpa [#allocation9 + $0x1], 1 }
 0x247   :  { %476 = vsyncmov [#allocation4] }
 0x24a   :  { %s477_s18 = vpop.sfrf %476 }
 0x24b   :  { %p613_p9 = scmp.ne.s32.totalorder %s477_s18, 0 }
 0x24d   :  { %481 = shalt.err (%p613_p9)  }
 0x24e   :  { %483 = vsyncmov [#allocation4 + $0x1] }
 0x251   :  { %s484_s17 = vpop.sfrf %483 }
 0x252   :  { %p614_p10 = scmp.ne.s32.totalorder %s484_s17, 0 }
 0x254   :  { %488 = shalt.err (%p614_p10)  }
 0x255   :  { %490 = vsyncmov [#allocation4 + $0x2] }
 0x258   :  { %s491_s11 = vpop.sfrf %490 }
 0x259   :  { %p615_p11 = scmp.ne.s32.totalorder %s491_s11, 0 }
 0x25b   :  { %495 = shalt.err (%p615_p11)  }
 0x25c   :  { %497 = vsyncmov [#allocation4 + $0x3] }
 0x25f   :  { %s498_s19 = vpop.sfrf %497 }
 0x260   :  { %p616_p1 = scmp.ne.s32.totalorder %s498_s19, 0 }
 0x262   :  { %502 = shalt.err (%p616_p1)  }
 0x263   :  { %504 = vsyncmov [#allocation4 + $0x4] }
 0x266   :  { %s505_s7 = vpop.sfrf %504 }
 0x267   :  { %p617_p3 = scmp.ne.s32.totalorder %s505_s7, 0 }
 0x269   :  { %509 = shalt.err (%p617_p3)  }
 0x26a   :  { %511 = vsyncmov [#allocation4 + $0x5] }
 0x26d   :  { %s512_s1 = vpop.sfrf %511 }
 0x26e   :  { %p618_p5 = scmp.ne.s32.totalorder %s512_s1, 0 }
 0x270   :  { %516 = shalt.err (%p618_p5)  }
 0x271   :  { %518 = vsyncmov [#allocation4 + $0x6] }
 0x274   :  { %s519_s2 = vpop.sfrf %518 }
 0x275   :  { %p619_p6 = scmp.ne.s32.totalorder %s519_s2, 0 }
 0x277   :  { %523 = shalt.err (%p619_p6)  }
 0x278   :  { %525 = vsyncmov [#allocation4 + $0x7] }
 0x27b   :  { %s526_s3 = vpop.sfrf %525 }
 0x27c   :  { %p620_p7 = scmp.ne.s32.totalorder %s526_s3, 0 }
 0x27e   :  { %530 = shalt.err (%p620_p7)  }

</bundles_post_ra>
